<compile_context>
chip_gen: v7x
topology: tpu7x:2x2x1
jax: 0.10.0
libtpu: 0.0.40
codegen_flags: <defaults>
</compile_context>

<pallas_src>
import functools

import jax
import jax.numpy as jnp
from jax.experimental import pallas as pl
from jax.experimental.pallas import tpu as pltpu


def _quantum_dropout_kernel(coin_ref, x_ref, u_ref, o_ref, *, p, scale):
    """One (TM, LANES) tile of quantum dropout.

    coin_ref : SMEM int32[1] scalar-prefetch ref; 1 -> use mask1, 0 -> mask2.
    x_ref    : VMEM activation tile.
    u_ref    : VMEM uniform-[0,1) f32 tile.
    o_ref    : VMEM output tile.
    """
    keep = u_ref[...] > jnp.float32(p)              # mask1 as a predicate (torch: rand > p)
    coin = coin_ref[0]
    # Scalar resolution of the global coin flip; the 1/(1-p) scale is folded
    # into the select so only one tile-sized mask exists and there is a single
    # full-tile multiply.
    s_keep = jnp.where(coin == 1, scale, 0.0).astype(x_ref.dtype)
    s_drop = jnp.where(coin == 1, 0.0, scale).astype(x_ref.dtype)
    o_ref[...] = (x_ref[...] * jnp.where(keep, s_keep, s_drop)).astype(o_ref.dtype)


def quantum_dropout(x, key, *, p=0.5, training=True, lanes=1024, max_row_tile=512):
    """QuantumDropout forward.  x: float array of any shape (e.g. NCHW)."""
    if (not training) or p == 0.0:
        return x

    orig_shape = x.shape
    total = x.size
    k_u, k_coin = jax.random.split(key)

    # Lane-dense slab layout: [rows, lanes], rows a multiple of the row tile,
    # row tile a multiple of 8 sublanes -> (8, 128) block constraint satisfied
    # for any input H, W.
    rows_min = pl.cdiv(total, lanes)
    tm = min(max_row_tile, ((rows_min + 7) // 8) * 8)
    rows = ((rows_min + tm - 1) // tm) * tm
    padded = rows * lanes

    x_flat = x.reshape(-1)
    if padded != total:
        x_flat = jnp.pad(x_flat, (0, padded - total))
    x2 = x_flat.reshape(rows, lanes)

    # Glue randomness (mirrors torch.rand_like(x) and the single coin flip).
    # Generated once for the whole slab, so there is no cross-tile correlation.
    u = jax.random.uniform(k_u, (rows, lanes), dtype=jnp.float32)
    coin = (jax.random.uniform(k_coin, (1,)) < 0.5).astype(jnp.int32)

    kernel = functools.partial(
        _quantum_dropout_kernel, p=float(p), scale=float(1.0 / (1.0 - p)))

    grid = rows // tm
    blk = lambda i, coin_ref: (i, 0)   # scalar-prefetch ref is a positional trailing arg

    out2 = pl.pallas_call(
        kernel,
        out_shape=jax.ShapeDtypeStruct((rows, lanes), x.dtype),
        grid_spec=pltpu.PrefetchScalarGridSpec(
            num_scalar_prefetch=1,                    # coin -> SMEM
            grid=(grid,),
            in_specs=[pl.BlockSpec((tm, lanes), blk),   # activation tile
                      pl.BlockSpec((tm, lanes), blk)],  # uniform tile
            out_specs=pl.BlockSpec((tm, lanes), blk),
        ),
        compiler_params=pltpu.CompilerParams(
            dimension_semantics=("parallel",),          # independent tiles -> megacore
            vmem_limit_bytes=32 * 1024 * 1024),
        # NOTE: input_output_aliases={1: 0} (x2 -> out) would save one HBM-sized
        # buffer; omitted to stay compatible with interpret-mode validation.
    )(coin, x2, u)

    return out2.reshape(-1)[:total].reshape(orig_shape)


if __name__ == "__main__":
    key = jax.random.PRNGKey(0)
    kx, kdrop = jax.random.split(key)

    # Small NCHW input consistent with a CNN feature map.
    x = jax.random.normal(kx, (2, 4, 16, 16), dtype=jnp.float32)

    p = 0.5
    y = quantum_dropout(x, kdrop, p=p, training=True)
    y = jax.block_until_ready(y)

    # Sanity: every output element is either 0 or x / (1 - p).
    scaled = x / (1.0 - p)
    is_zero = jnp.abs(y) < 1e-6
    is_scaled = jnp.abs(y - scaled) < 1e-5
    assert bool(jnp.all(is_zero | is_scaled)), "output not consistent with dropout mask"
    assert y.shape == x.shape and y.dtype == x.dtype

    # Mask should be non-trivial for p = 0.5 (either coin branch keeps ~50%).
    frac_kept = float(jnp.mean((is_scaled & ~is_zero).astype(jnp.float32)))
    assert 0.2 < frac_kept < 0.8, f"suspicious keep fraction {frac_kept}"

    # Eval mode / p == 0 pass-through.
    y_eval = quantum_dropout(x, kdrop, p=p, training=False)
    assert bool(jnp.all(y_eval == x))

    print("KERNEL_OK")
</pallas_src>

<mosaic_0001>
module attributes {stable_mosaic.version = 11 : i64} {
  func.func @_quantum_dropout_kernel(%arg0: i32, %arg1: memref<1xi32, #tpu.memory_space<smem>>, %arg2: memref<8x1024xf32, #tpu.memory_space<vmem>>, %arg3: memref<8x1024xf32, #tpu.memory_space<vmem>>, %arg4: memref<8x1024xf32, #tpu.memory_space<vmem>>) attributes {dimension_semantics = [#tpu.dimension_semantics<parallel>], iteration_bounds = array<i64: 1>, scalar_prefetch = 1 : i64, scratch_operands = 0 : i64, tpu.core_type = #tpu.core_type<tc>, window_params = [{transform_indices = @transform_0, window_bounds = array<i64: 8, 1024>}, {transform_indices = @transform_1, window_bounds = array<i64: 8, 1024>}, {transform_indices = @transform_2, window_bounds = array<i64: 8, 1024>}]} {
    %c0 = arith.constant 0 : index
    %c0_0 = arith.constant 0 : index
    %0 = vector.load %arg3[%c0, %c0_0] : memref<8x1024xf32, #tpu.memory_space<vmem>>, vector<8x1024xf32>
    %cst = arith.constant 5.000000e-01 : f32
    %1 = vector.broadcast %cst : f32 to vector<8x1024xf32>
    %2 = arith.cmpf ogt, %0, %1 : vector<8x1024xf32>
    %c0_1 = arith.constant 0 : index
    %3 = memref.load %arg1[%c0_1] : memref<1xi32, #tpu.memory_space<smem>>
    %c1_i32 = arith.constant 1 : i32
    %4 = arith.cmpi eq, %3, %c1_i32 : i32
    %cst_2 = arith.constant 2.000000e+00 : f32
    %cst_3 = arith.constant 0.000000e+00 : f32
    %5 = arith.select %4, %cst_2, %cst_3 : f32
    %c1_i32_4 = arith.constant 1 : i32
    %6 = arith.cmpi eq, %3, %c1_i32_4 : i32
    %cst_5 = arith.constant 0.000000e+00 : f32
    %cst_6 = arith.constant 2.000000e+00 : f32
    %7 = arith.select %6, %cst_5, %cst_6 : f32
    %c0_7 = arith.constant 0 : index
    %c0_8 = arith.constant 0 : index
    %8 = vector.load %arg2[%c0_7, %c0_8] : memref<8x1024xf32, #tpu.memory_space<vmem>>, vector<8x1024xf32>
    %9 = vector.broadcast %5 : f32 to vector<8x1024xf32>
    %10 = vector.broadcast %7 : f32 to vector<8x1024xf32>
    %11 = arith.select %2, %9, %10 : vector<8x1024xi1>, vector<8x1024xf32>
    %12 = arith.mulf %8, %11 : vector<8x1024xf32>
    %c0_9 = arith.constant 0 : index
    %c0_10 = arith.constant 0 : index
    %13 = vector.load %arg4[%c0_9, %c0_10] : memref<8x1024xf32, #tpu.memory_space<vmem>>, vector<8x1024xf32>
    tpu.vector_store %arg4[%c0_9, %c0_10], %12 {strides = array<i32>} : memref<8x1024xf32, #tpu.memory_space<vmem>>, vector<8x1024xf32>,
    return
  }
  func.func @transform_0(%arg0: i32, %arg1: memref<1xi32, #tpu.memory_space<smem>>) -> (i32, i32) {
    %c0_i32 = arith.constant 0 : i32
    %c0_i32_0 = arith.constant 0 : i32
    return %arg0, %c0_i32 : i32, i32
  }
  func.func @transform_1(%arg0: i32, %arg1: memref<1xi32, #tpu.memory_space<smem>>) -> (i32, i32) {
    %c0_i32 = arith.constant 0 : i32
    %c0_i32_0 = arith.constant 0 : i32
    return %arg0, %c0_i32 : i32, i32
  }
  func.func @transform_2(%arg0: i32, %arg1: memref<1xi32, #tpu.memory_space<smem>>) -> (i32, i32) {
    %c0_i32 = arith.constant 0 : i32
    %c0_i32_0 = arith.constant 0 : i32
    return %arg0, %c0_i32 : i32, i32
  }
}

</mosaic_0001>

<bundles_post_ra>
// kernel: tpu_custom_call.1
= control target key start
LH: loop header
LB: loop body
LE: loop exit
PB: predicated region body
PF: predicated region fallthrough
CT: control target
= control target key end

     0   :  { %9 = vsyncpa [#allocation5], 0  ;;  %s245_s0 = inlined_call_operand.<no memory space> [shape: s32[1], index: 0, kind: input, shape index: {}]   ;;  %s246_s1 = inlined_call_operand.hbm [shape: f32[8,1024], index: 1, kind: input, shape index: {}]   ;;  %s247_s2 = inlined_call_operand.hbm [shape: f32[8,1024], index: 2, kind: input, shape index: {}]   ;;  %s248_s3 = inlined_call_operand.hbm [shape: f32[8,1024], index: 3, kind: output, shape index: {}]  }
   0x1   :  { %10 = vsyncpa [#allocation8], 0 }
   0x2   :  { %11 = vsyncpa [#allocation6], 0  ;;  %s183_s12 = smov [#allocation4]   ;;  %s184_s14 = smov [#allocation7]  }
   0x3   :  { %s18_s13 = sshll.u32 %s183_s12, 4  ;;  %s28_s15 = sshll.u32 %s184_s14, 4  ;;  %s19_s13 = int_to_ptr.vmem [resolvable:$true] %s18_s13  ;;  %s29_s15 = int_to_ptr.vmem [resolvable:$true] %s28_s15 }
   0x4   :  { %s111_s18 = scalar_lea.hbm %s246_s1, 1024 }
   0x5   :  { %p112_p0 = scmp.ne.s32.totalorder %s246_s1, %s111_s18  ;;  %p115_p1 = scmp.lt.u32.totalorder %s111_s18, %s246_s1 }
   0x7   :  { %p117_p2 = pnand %p115_p1, %p112_p0 }
   0x9   :  { %120 = shalt.err (!%p117_p2)
}
   0xa   :  { %s121_s23 = scalar_lea.vmem %s19_s13, 1024  ;;  %p126_p4 = scmp.lt.s32.totalorder %s19_s13, %s19_s13 }
   0xb   :  { %p122_p3 = scmp.ne.s32.totalorder %s19_s13, %s121_s23  ;;  %p127_p5 = scmp.lt.s32.totalorder %s121_s23, %s121_s23 }
   0xd   :  { %p128_p6 = por %p127_p5, %p126_p4 }
   0xf   :  { %p129_p7 = pnand %p128_p6, %p122_p3 }
  0x11   :  { %132 = shalt.err (!%p129_p7)
}
  0x12   :  { %21 = dma.hbm_to_vmem [thread:$0]  %s246_s1, 1024, %s19_s13, [#allocation5]  }
  0x13   :  { %s133_s28 = scalar_lea.hbm %s247_s2, 1024 }
  0x14   :  { %p134_p8 = scmp.ne.s32.totalorder %s247_s2, %s133_s28  ;;  %p137_p9 = scmp.lt.u32.totalorder %s133_s28, %s247_s2 }
  0x16   :  { %p139_p10 = pnand %p137_p9, %p134_p8 }
  0x18   :  { %142 = shalt.err (!%p139_p10)
}
  0x19   :  { %s143_s6 = scalar_lea.vmem %s29_s15, 1024  ;;  %p148_p12 = scmp.lt.s32.totalorder %s29_s15, %s29_s15 }
  0x1a   :  { %p144_p11 = scmp.ne.s32.totalorder %s29_s15, %s143_s6  ;;  %p149_p13 = scmp.lt.s32.totalorder %s143_s6, %s143_s6 }
  0x1c   :  { %p150_p0 = por %p149_p13, %p148_p12 }
  0x1e   :  { %p151_p1 = pnand %p150_p0, %p144_p11 }
  0x20   :  { %154 = shalt.err (!%p151_p1)
}
  0x21   :  { %31 = dma.hbm_to_vmem [thread:$0]  %s247_s2, 1024, %s29_s15, [#allocation8]  }
  0x22   :  { %177 = dma.done.wait [#allocation5], 1024  }
  0x23   :  { %178 = vsyncadd [#allocation5], 4294966272 }
  0x24   :  { %179 = dma.done.wait [#allocation8], 1024  }
  0x25   :  { %180 = vsyncadd [#allocation8], 4294966272  ;;  %p55_p2 = scmp.eq.s32.totalorder %s245_s0, 1  ;;  %v38_v2 = vld [vmem:[#allocation7] sm:$0xff]  ;;  %v39_v4 = vld [vmem:[#allocation7 + $0x8] sm:$0xff]  ;;  %s185_s0 = smov [#allocation9]  }
  0x26   :  { %v58_v3 = vld [vmem:[#allocation4] sm:$0xff]  ;;  %vm46_vm0 = vcmp.gt.f32.partialorder %v38_v2, 0.5  ;;  %vm47_vm1 = vcmp.gt.f32.partialorder %v39_v4, 0.5  ;;  %v59_v5 = vld [vmem:[#allocation4 + $0x8] sm:$0xff]  ;;  %v40_v6 = vld [vmem:[#allocation7 + $0x10] sm:$0xff]  ;;  %s98_s2 = sshll.u32 %s185_s0, 4  ;;  %s99_s2 = int_to_ptr.vmem [resolvable:$true] %s98_s2 }
  0x27   :  { %s56_s10 = scalar_select %p55_p2, 2.0, 0.0  ;;  %v60_v7 = vld [vmem:[#allocation4 + $0x10] sm:$0xff]  ;;  %vm48_vm2 = vcmp.gt.f32.partialorder %v40_v6, 0.5  ;;  %v41_v10 = vld [vmem:[#allocation7 + $0x18] sm:$0xff]  ;;  %v42_v12 = vld [vmem:[#allocation7 + $0x20] sm:$0xff] }
  0x28   :  { %s57_s11 = scalar_select %p55_p2, 0.0, 2.0  ;;  %v61_v11 = vld [vmem:[#allocation4 + $0x18] sm:$0xff]  ;;  %vm49_vm3 = vcmp.gt.f32.partialorder %v41_v10, 0.5  ;;  %v62_v16 = vld [vmem:[#allocation4 + $0x20] sm:$0xff]  ;;  %v43_v17 = vld [vmem:[#allocation7 + $0x28] sm:$0xff] }
  0x29   :  { %v66_v0 = vstv %s56_s10  ;;  %v63_v18 = vld [vmem:[#allocation4 + $0x28] sm:$0xff]  ;;  %vm50_vm4 = vcmp.gt.f32.partialorder %v42_v12, 0.5  ;;  %vm51_vm5 = vcmp.gt.f32.partialorder %v43_v17, 0.5  ;;  %v44_v21 = vld [vmem:[#allocation7 + $0x30] sm:$0xff]  ;;  %v45_v23 = vld [vmem:[#allocation7 + $0x38] sm:$0xff]  ;;  %s155_s12 = scalar_lea.vmem %s99_s2, 1024  ;;  %p160_p4 = scmp.lt.s32.totalorder %s99_s2, %s99_s2 }
  0x2a   :  { %v67_v1 = vstv %s57_s11  ;;  %v64_v22 = vld [vmem:[#allocation4 + $0x30] sm:$0xff]  ;;  %vm52_vm6 = vcmp.gt.f32.partialorder %v44_v21, 0.5  ;;  %v65_v27 = vld [vmem:[#allocation4 + $0x38] sm:$0xff]  ;;  %vm53_vm7 = vcmp.gt.f32.partialorder %v45_v23, 0.5  ;;  %p156_p3 = scmp.ne.s32.totalorder %s99_s2, %s155_s12  ;;  %p161_p5 = scmp.lt.s32.totalorder %s155_s12, %s155_s12 }
  0x2b   :  { %v68_v8 = vsel %vm46_vm0, %v66_v0, %v67_v1  ;;  %v69_v9 = vsel %vm47_vm1, %v66_v0, %v67_v1  ;;  %v70_v15 = vsel %vm48_vm2, %v66_v0, %v67_v1  ;;  %v71_v20 = vsel %vm49_vm3, %v66_v0, %v67_v1 }
  0x2c   :  { %v76_v13 = vmul.f32 %v68_v8, %v58_v3  ;;  %v77_v14 = vmul.f32 %v69_v9, %v59_v5  ;;  %v78_v19 = vmul.f32 %v70_v15, %v60_v7  ;;  %v79_v24 = vmul.f32 %v71_v20, %v61_v11  ;;  %p162_p6 = por %p161_p5, %p160_p4 }
  0x2d   :  { %v72_v25 = vsel %vm50_vm4, %v66_v0, %v67_v1  ;;  %v73_v26 = vsel %vm51_vm5, %v66_v0, %v67_v1  ;;  %v74_v30 = vsel %vm52_vm6, %v66_v0, %v67_v1  ;;  %v75_v32 = vsel %vm53_vm7, %v66_v0, %v67_v1 }
  0x2e   :  { %84 = vst [vmem:[#allocation9] sm:$0xff] %v76_v13  ;;  %85 = vst [vmem:[#allocation9 + $0x8] sm:$0xff] %v77_v14  ;;  %v80_v28 = vmul.f32 %v72_v25, %v62_v16  ;;  %v81_v29 = vmul.f32 %v73_v26, %v63_v18  ;;  %v82_v31 = vmul.f32 %v74_v30, %v64_v22  ;;  %p163_p7 = pnand %p162_p6, %p156_p3 }
  0x2f   :  { %86 = vst [vmem:[#allocation9 + $0x10] sm:$0xff] %v78_v19  ;;  %87 = vst [vmem:[#allocation9 + $0x18] sm:$0xff] %v79_v24  ;;  %v83_v33 = vmul.f32 %v75_v32, %v65_v27 }
  0x30   :  { %88 = vst [vmem:[#allocation9 + $0x20] sm:$0xff] %v80_v28  ;;  %89 = vst [vmem:[#allocation9 + $0x28] sm:$0xff] %v81_v29 }
  0x31   :  { %90 = vst [vmem:[#allocation9 + $0x30] sm:$0xff] %v82_v31  ;;  %91 = vst [vmem:[#allocation9 + $0x38] sm:$0xff] %v83_v33 }
  0x32   :  { %166 = shalt.err (!%p163_p7)
}
  0x33   :  { %s167_s15 = scalar_lea.hbm %s248_s3, 1024 }
  0x34   :  { %p168_p8 = scmp.ne.s32.totalorder %s248_s3, %s167_s15  ;;  %p171_p9 = scmp.lt.u32.totalorder %s167_s15, %s248_s3 }
  0x36   :  { %p173_p10 = pnand %p171_p9, %p168_p8 }
  0x38   :  { %176 = shalt.err (!%p173_p10)
}
  0x39   :  { %101 = dma.vmem_to_hbm [thread:$0]  %s99_s2, 1024, %s248_s3, [#allocation6]  }
  0x3a   :  { %181 = dma.done.wait [#allocation6], 1024  }
  0x3b   :  { %182 = vsyncadd [#allocation6], 4294966272 }
  0x3c   :  { %105 = vsyncpa [#allocation5], 1 }
  0x3d   :  { %106 = vsyncpa [#allocation8], 1 }
  0x3e   :  { %107 = vsyncpa [#allocation6], 1 }

</bundles_post_ra>
